<compile_context>
chip_gen: v6e
topology: v6e:2x2x1
jax: 0.10.0
libtpu: 0.0.40
codegen_flags: <defaults>
</compile_context>

<pallas_src>
import math

import jax
import jax.numpy as jnp
from jax import lax
from jax.experimental import pallas as pl
from jax.experimental.pallas import tpu as pltpu

# ----------------------------- configuration -----------------------------
BATCH = 2
LATENT_DIM = 16
N_ATOMS = 16
WINDOW_SIZE = 16          # ResonanceBank window_size (only used by the unused fft path)
N_FRAMES = 16
TOTAL_SAMPLES = 128       # == ResonanceBank.n_samples == initial.shape[-1]
MIX_CHANNELS = 4
CHANNELS = 8              # ConvUpsample internal channels
IMPULSE_SAMPLES = 64
UP_START = 4              # ConvUpsample start_size

BASE_RESONANCE = 0.02
RES_FACTOR = (1.0 - BASE_RESONANCE) * 0.99

T = TOTAL_SAMPLES
BM = BATCH * MIX_CHANNELS      # batch-folded row count (8)
N4 = 4 * T                     # fused-convolution transform length (512)
CP = N4 // 2                   # 256 packed complex bins -> exactly 2*CP = 512 lanes

# MXU operand dtype for the big DFT matmuls (accumulation is always f32).
# Set to jnp.float32 for bit-closer parity with the f32 PyTorch reference.
MXU_DTYPE = jnp.bfloat16


# ------------------------------ Pallas kernel ------------------------------
def resonance_block_kernel(sel_ref, dlog_ref, fimp_ref, mixp_ref, impb_ref,
                           gtn_ref, gtd_ref, bank_ref, cum_ref, interp_ref,
                           ffwd_ref, finv_re_ref, finv_im_ref, out_ref):
    """Whole ResonanceBlock numeric core, batch folded into rows (single invocation).

    sel_ref    : (BM, A)    per-(batch, channel) resonance selections (post ReLU head)
    dlog_ref   : (BM, F)    decay head output (pre-sigmoid)
    fimp_ref   : (2*BM, T)  rows [0,BM) windowed/padded filters,
                            rows [BM,2*BM) padded impulse repeated per mix channel
    mixp_ref   : (BM, F)    ConvUpsample mix frames (pre-interp, pre-softmax)
    impb_ref   : (B, T)     padded impulse, pre-scaled by final-mix weight fmix[:, 0]
    gtn_ref    : (B, BM)    channel->batch group-sum matrix, pre-scaled by fmix[:, 1]
    gtd_ref    : (B, BM)    channel->batch group-sum matrix (softmax denominator)
    bank_ref   : (A, T)     resonance bank samples ("initial")
    cum_ref    : (F, F)     upper-triangular ones -> cumsum along frames as a matmul
    interp_ref : (F, T)     linear-interpolation matrix (frames -> samples)
    ffwd_ref   : (T, 2*CP)  [Re | Im] packed 512-pt real DFT of a causal length-T signal
    finv_re/im : (CP, T)    inverse-transform halves, truncated to the first T samples
    out_ref    : (B, T)
    """
    f32 = jnp.float32
    interp = interp_ref[...]

    # ResonanceBank decay envelope:
    #   sigmoid -> affine -> log -> cumsum (matmul) -> exp -> linear interp (matmul)
    d = BASE_RESONANCE + jax.nn.sigmoid(dlog_ref[...]) * RES_FACTOR
    dec = jnp.exp(jnp.dot(jnp.log(1e-12 + d), cum_ref[...],
                          preferred_element_type=f32))                        # (BM, F)
    amp = jnp.dot(dec, interp, preferred_element_type=f32)                    # (BM, T)

    # ResonanceBank: res = (selection @ res_samples) * amp
    res = jnp.dot(sel_ref[...], bank_ref[...],
                  preferred_element_type=f32) * amp                           # (BM, T)

    # ONE stacked forward transform of [filters ; impulse ; resonances].
    lhs = jnp.concatenate([fimp_ref[...], res], axis=0).astype(MXU_DTYPE)     # (3*BM, T)
    spec = jnp.dot(lhs, ffwd_ref[...], preferred_element_type=f32)            # (3*BM, 2*CP)

    a_re, a_im = spec[:BM, :CP], spec[:BM, CP:]               # filter spectra
    i_re, i_im = spec[BM:2 * BM, :CP], spec[BM:2 * BM, CP:]   # impulse spectra
    r_re, r_im = spec[2 * BM:, :CP], spec[2 * BM:, CP:]       # resonance spectra

    # Fused fft_convolve(filt, res) then fft_convolve(., impulse): complex triple product.
    p_re = a_re * r_re - a_im * r_im
    p_im = a_re * r_im + a_im * r_re
    s_re = p_re * i_re - p_im * i_im
    s_im = p_re * i_im + p_im * i_re

    # Inverse transform truncated to the first T samples: two accumulating dots
    # (no lane-axis concatenate; accumulates in place in the MXU result buffer on v7x).
    final = (jnp.dot(s_re.astype(MXU_DTYPE), finv_re_ref[...], preferred_element_type=f32)
             + jnp.dot(s_im.astype(MXU_DTYPE), finv_im_ref[...], preferred_element_type=f32))

    # TimeVaryingMix: interpolate mix frames, softmax over channels, weighted channel sum.
    # Softmax + channel reduction use tiny group-sum matmuls (no sublane reshapes):
    #   mixed_b = (sum_c final*exp(mix)) / (sum_c exp(mix)); shift is channel-independent.
    mix = jnp.dot(mixp_ref[...], interp, preferred_element_type=f32)          # (BM, T)
    e = jnp.exp(mix - jnp.max(mix, axis=0, keepdims=True))
    num = jnp.dot(gtn_ref[...], final * e, preferred_element_type=f32)        # (B,T)*fmix[:,1]
    den = jnp.dot(gtd_ref[...], e, preferred_element_type=f32)                # (B, T)

    # Final impulse/resonance blend (impulse already scaled by fmix[:,0] outside).
    out_ref[...] = impb_ref[...] + num * pl.reciprocal(den, approx=True)


def run_resonance_block(sel, dlogit, fimp, mixp, impb, gtn, gtd,
                        bank, cum, interp, f_fwd, f_inv_re, f_inv_im):
    args = (sel, dlogit, fimp, mixp, impb, gtn, gtd,
            bank, cum, interp, f_fwd, f_inv_re, f_inv_im)
    return pl.pallas_call(
        resonance_block_kernel,
        out_shape=jax.ShapeDtypeStruct((BATCH, T), jnp.float32),
        in_specs=[pl.BlockSpec(memory_space=pltpu.MemorySpace.VMEM) for _ in args],
        out_specs=pl.BlockSpec(memory_space=pltpu.MemorySpace.VMEM),
    )(*args)


# --------------------- constant matrices (built once) ---------------------
def dft_matrices():
    """Packed 512-pt real-DFT matrices implementing both fft_convolve calls at once.

    "Odd-frequency" (negacyclic) real transform: bins at w_k = 2*pi*(k+0.5)/N4,
    k = 0..CP-1.  These 256 complex bins carry exactly the 512 real DOF of a real
    length-N4 signal (no redundant/self-conjugate bins), so there is zero lane
    padding and no DC/Nyquist fix-ups in the complex multiply.  Bin-wise products
    give negacyclic convolution over N4; since filt*res*impulse has linear length
    3*T-2 = 382 < N4 nothing wraps, so the first T samples equal the reference
    pad->rfft->multiply->irfft->truncate chain applied twice.
    """
    t = jnp.arange(T, dtype=jnp.float32)[:, None]           # inputs are zero beyond T
    k = jnp.arange(CP, dtype=jnp.float32)[None, :]
    ang_f = 2.0 * jnp.pi * t * (k + 0.5) / N4                # (T, CP)
    f_fwd = jnp.concatenate([jnp.cos(ang_f), -jnp.sin(ang_f)], axis=1)      # (T, 2*CP)
    n = jnp.arange(T, dtype=jnp.float32)[None, :]
    ang_i = 2.0 * jnp.pi * (k.T + 0.5) * n / N4              # (CP, T)
    f_inv_re = (2.0 / N4) * jnp.cos(ang_i)
    f_inv_im = -(2.0 / N4) * jnp.sin(ang_i)
    return (f_fwd.astype(MXU_DTYPE), f_inv_re.astype(MXU_DTYPE),
            f_inv_im.astype(MXU_DTYPE))


def interp_matrix(in_size, out_size):
    """Dense matrix W so that x @ W == F.interpolate(x, mode='linear', align_corners=False)."""
    pos = (jnp.arange(out_size, dtype=jnp.float32) + 0.5) * (in_size / out_size) - 0.5
    pos = jnp.clip(pos, 0.0, in_size - 1)
    lo = jnp.floor(pos).astype(jnp.int32)
    hi = jnp.minimum(lo + 1, in_size - 1)
    w = pos - lo.astype(jnp.float32)
    rows = jnp.arange(in_size)[:, None]
    W = ((rows == lo[None, :]).astype(jnp.float32) * (1.0 - w)[None, :]
         + (rows == hi[None, :]).astype(jnp.float32) * w[None, :])
    return W                                                  # (in_size, out_size)


def cumsum_matrix(n):
    """x @ U == cumsum(x, axis=-1)."""
    return jnp.triu(jnp.ones((n, n), jnp.float32))


# ------------------------------ JAX glue ------------------------------
def hamming_window(n):
    # torch.hamming_window (periodic=True)
    i = jnp.arange(n, dtype=jnp.float32)
    return 0.54 - 0.46 * jnp.cos(2.0 * jnp.pi * i / n)


def conv1d_same(x, w, b):
    # x: (N, Cin, L), w: (Cout, Cin, 3), 'same' padding
    y = lax.conv_general_dilated(x, w, (1,), ((1, 1),),
                                 dimension_numbers=("NCH", "OIH", "NCH"))
    return y + b[None, :, None]


def conv_upsample_apply(p, z):
    # TODO(synk): ConvUpsample body was not provided; using the standard
    # Linear -> [nearest x2 upsample, Conv1d(k=3), LeakyReLU(0.2)]* -> Conv1d(k=3)
    # structure (weight_norm folds into the fixed weights here).
    x = z @ p["lin_w"] + p["lin_b"]                       # (B, CHANNELS*UP_START)
    x = x.reshape(-1, CHANNELS, UP_START)
    for (w, b) in p["layers"]:
        x = jnp.repeat(x, 2, axis=-1)                     # nearest-neighbor x2
        x = conv1d_same(x, w, b)
        x = jax.nn.leaky_relu(x, 0.2)
    x = conv1d_same(x, p["final_w"], p["final_b"])        # (B, MIX_CHANNELS, N_FRAMES)
    return x


def init_params(key):
    n_up = int(math.log2(N_FRAMES) - math.log2(UP_START))
    keys = jax.random.split(key, 12 + n_up)
    ki = iter(range(len(keys)))

    def dense(shape, scale=0.1):
        return scale * jax.random.normal(keys[next(ki)], shape, dtype=jnp.float32)

    params = {
        # per-mix-channel choice heads: Linear(latent, n_atoms) + ReLU
        "res_w": dense((MIX_CHANNELS, LATENT_DIM, N_ATOMS)),
        "res_b": jnp.zeros((MIX_CHANNELS, N_ATOMS), jnp.float32),
        "init_w": dense((MIX_CHANNELS, LATENT_DIM, N_ATOMS)),
        "init_b": jnp.zeros((MIX_CHANNELS, N_ATOMS), jnp.float32),
        "filt_w": dense((MIX_CHANNELS, LATENT_DIM, N_ATOMS)),
        "filt_b": jnp.zeros((MIX_CHANNELS, N_ATOMS), jnp.float32),
        # ResonanceBank parameters
        "decay_w": dense((N_ATOMS, N_FRAMES)),
        "decay_b": jnp.zeros((N_FRAMES,), jnp.float32),
        "filters": jax.random.uniform(keys[next(ki)], (N_ATOMS, N_FRAMES),
                                      minval=-1.0, maxval=1.0, dtype=jnp.float32),
        "res_samples": dense((N_ATOMS, TOTAL_SAMPLES)),       # "initial"
        # final impulse/resonance mix
        "fmix_w": dense((LATENT_DIM, 2)),
        "fmix_b": jnp.zeros((2,), jnp.float32),
        # TimeVaryingMix ConvUpsample
        "upsample": {
            "lin_w": dense((LATENT_DIM, CHANNELS * UP_START)),
            "lin_b": jnp.zeros((CHANNELS * UP_START,), jnp.float32),
            "layers": [(dense((CHANNELS, CHANNELS, 3)),
                        jnp.zeros((CHANNELS,), jnp.float32)) for _ in range(n_up)],
            "final_w": dense((MIX_CHANNELS, CHANNELS, 3)),
            "final_b": jnp.zeros((MIX_CHANNELS,), jnp.float32),
        },
    }
    return params


def resonance_block_forward(params, x, impulse, consts):
    cum, interp, f_fwd, f_inv_re, f_inv_im = consts
    batch = x.shape[0]
    imp_samples = impulse.shape[-1]

    # Choice heads (Linear + ReLU), one per mix channel.
    res_sel = jax.nn.relu(jnp.einsum("bl,mla->bma", x, params["res_w"]) + params["res_b"])
    init_sel = jax.nn.relu(jnp.einsum("bl,mla->bma", x, params["init_w"]) + params["init_b"])
    filt_sel = jax.nn.relu(jnp.einsum("bl,mla->bma", x, params["filt_w"]) + params["filt_b"])

    # Decay head (linear part only; sigmoid/cumsum/exp/interp run on the VPU in-kernel).
    dlogit = init_sel @ params["decay_w"] + params["decay_b"]                  # (B, M, F)

    # ResonanceBank filter: selection @ filters, hamming window, zero-pad to T.
    filt = (filt_sel @ params["filters"]) * hamming_window(N_FRAMES)           # (B, M, F)
    filt = jnp.pad(filt, ((0, 0), (0, 0), (0, T - N_FRAMES)))                  # (B, M, T)

    # Impulse zero-padded to total_samples.
    imp = jnp.pad(impulse.reshape(batch, imp_samples),
                  ((0, 0), (0, T - imp_samples)))                              # (B, T)

    # TimeVaryingMix frames (interp + channel softmax happen inside the kernel).
    mixp = conv_upsample_apply(params["upsample"], x)                          # (B, M, F)

    # Final impulse/resonance mix weights.
    fmix = jax.nn.softmax(x @ params["fmix_w"] + params["fmix_b"], axis=-1)    # (B, 2)

    # Batch-folded, 8-sublane-aligned row stacking for the single forward-DFT matmul:
    #   rows [0, BM)     -> windowed/padded filters
    #   rows [BM, 2*BM)  -> padded impulse repeated across mix channels
    # (resonance rows are computed in-kernel and appended there).
    filt_rows = filt.reshape(batch * MIX_CHANNELS, T)
    imp_rows = jnp.broadcast_to(imp[:, None, :],
                                (batch, MIX_CHANNELS, T)).reshape(batch * MIX_CHANNELS, T)
    fimp = jnp.concatenate([filt_rows, imp_rows], axis=0)                      # (2*BM, T)

    # Channel->batch group-sum matrix; final-mix weights folded into it / the impulse.
    gt = (jnp.arange(batch * MIX_CHANNELS)[None, :] // MIX_CHANNELS
          == jnp.arange(batch)[:, None]).astype(jnp.float32)                   # (B, BM)
    gtn = gt * fmix[:, 1:2]
    impb = imp * fmix[:, 0:1]

    out = run_resonance_block(
        res_sel.reshape(batch * MIX_CHANNELS, N_ATOMS),
        dlogit.reshape(batch * MIX_CHANNELS, N_FRAMES),
        fimp,
        mixp.reshape(batch * MIX_CHANNELS, N_FRAMES),
        impb, gtn, gt,
        params["res_samples"], cum, interp, f_fwd, f_inv_re, f_inv_im)          # (B, T)
    return out.reshape(batch, 1, T)                                             # free reshape


# ------------------------------ main ------------------------------
if __name__ == "__main__":
    key = jax.random.PRNGKey(0)
    k_params, k_x, k_imp = jax.random.split(key, 3)

    params = init_params(k_params)
    x = jax.random.normal(k_x, (BATCH, LATENT_DIM), dtype=jnp.float32)
    impulse = jax.random.normal(k_imp, (BATCH, 1, IMPULSE_SAMPLES), dtype=jnp.float32)

    consts = (cumsum_matrix(N_FRAMES), interp_matrix(N_FRAMES, T)) + dft_matrices()

    fwd = jax.jit(resonance_block_forward)
    out = fwd(params, x, impulse, consts)
    jax.block_until_ready(out)

    assert out.shape == (BATCH, 1, TOTAL_SAMPLES), out.shape
    assert out.dtype == jnp.float32
    assert bool(jnp.all(jnp.isfinite(out)))
    print("KERNEL_OK")
</pallas_src>

<mosaic_0001>
module attributes {stable_mosaic.version = 11 : i64} {
  func.func @resonance_block_kernel(%arg0: memref<8x16xf32, #tpu.memory_space<vmem>>, %arg1: memref<8x16xf32, #tpu.memory_space<vmem>>, %arg2: memref<16x128xf32, #tpu.memory_space<vmem>>, %arg3: memref<8x16xf32, #tpu.memory_space<vmem>>, %arg4: memref<2x128xf32, #tpu.memory_space<vmem>>, %arg5: memref<2x8xf32, #tpu.memory_space<vmem>>, %arg6: memref<2x8xf32, #tpu.memory_space<vmem>>, %arg7: memref<16x128xf32, #tpu.memory_space<vmem>>, %arg8: memref<16x16xf32, #tpu.memory_space<vmem>>, %arg9: memref<16x128xf32, #tpu.memory_space<vmem>>, %arg10: memref<128x512xbf16, #tpu.memory_space<vmem>>, %arg11: memref<256x128xbf16, #tpu.memory_space<vmem>>, %arg12: memref<256x128xbf16, #tpu.memory_space<vmem>>, %arg13: memref<2x128xf32, #tpu.memory_space<vmem>>) attributes {dimension_semantics = [], scalar_prefetch = 0 : i64, scratch_operands = 0 : i64, tpu.core_type = #tpu.core_type<tc>} {
    %c0 = arith.constant 0 : index
    %c0_0 = arith.constant 0 : index
    %0 = vector.load %arg9[%c0, %c0_0] : memref<16x128xf32, #tpu.memory_space<vmem>>, vector<16x128xf32>
    %c0_1 = arith.constant 0 : index
    %c0_2 = arith.constant 0 : index
    %1 = vector.load %arg1[%c0_1, %c0_2] : memref<8x16xf32, #tpu.memory_space<vmem>>, vector<8x16xf32>
    %2 = arith.negf %1 : vector<8x16xf32>
    %3 = math.exp %2 : vector<8x16xf32>
    %cst = arith.constant 1.000000e+00 : f32
    %4 = vector.broadcast %cst : f32 to vector<8x16xf32>
    %5 = arith.addf %4, %3 : vector<8x16xf32>
    %6 = arith.divf %4, %5 : vector<8x16xf32>
    %cst_3 = arith.constant 9.702000e-01 : f32
    %7 = vector.broadcast %cst_3 : f32 to vector<8x16xf32>
    %8 = arith.mulf %6, %7 : vector<8x16xf32>
    %cst_4 = arith.constant 2.000000e-02 : f32
    %9 = vector.broadcast %cst_4 : f32 to vector<8x16xf32>
    %10 = arith.addf %9, %8 : vector<8x16xf32>
    %cst_5 = arith.constant 9.99999996E-13 : f32
    %11 = vector.broadcast %cst_5 : f32 to vector<8x16xf32>
    %12 = arith.addf %11, %10 : vector<8x16xf32>
    %13 = math.log %12 : vector<8x16xf32>
    %c0_6 = arith.constant 0 : index
    %c0_7 = arith.constant 0 : index
    %14 = vector.load %arg8[%c0_6, %c0_7] : memref<16x16xf32, #tpu.memory_space<vmem>>, vector<16x16xf32>
    %cst_8 = arith.constant dense<0.000000e+00> : vector<8x16xf32>
    %15 = tpu.matmul %13, %14, %cst_8 {dimension_numbers = #tpu.dot_dimension_numbers<[1], [0], [0], [1], [0, 0, 1, 1], [], []>} : vector<8x16xf32>, vector<16x16xf32>, vector<8x16xf32> -> vector<8x16xf32>
    %16 = math.exp %15 : vector<8x16xf32>
    %cst_9 = arith.constant dense<0.000000e+00> : vector<8x128xf32>
    %17 = tpu.matmul %16, %0, %cst_9 {dimension_numbers = #tpu.dot_dimension_numbers<[1], [0], [0], [1], [0, 0, 1, 1], [], []>} : vector<8x16xf32>, vector<16x128xf32>, vector<8x128xf32> -> vector<8x128xf32>
    %c0_10 = arith.constant 0 : index
    %c0_11 = arith.constant 0 : index
    %18 = vector.load %arg0[%c0_10, %c0_11] : memref<8x16xf32, #tpu.memory_space<vmem>>, vector<8x16xf32>
    %c0_12 = arith.constant 0 : index
    %c0_13 = arith.constant 0 : index
    %19 = vector.load %arg7[%c0_12, %c0_13] : memref<16x128xf32, #tpu.memory_space<vmem>>, vector<16x128xf32>
    %cst_14 = arith.constant dense<0.000000e+00> : vector<8x128xf32>
    %20 = tpu.matmul %18, %19, %cst_14 {dimension_numbers = #tpu.dot_dimension_numbers<[1], [0], [0], [1], [0, 0, 1, 1], [], []>} : vector<8x16xf32>, vector<16x128xf32>, vector<8x128xf32> -> vector<8x128xf32>
    %21 = arith.mulf %20, %17 : vector<8x128xf32>
    %c0_15 = arith.constant 0 : index
    %c0_16 = arith.constant 0 : index
    %22 = vector.load %arg2[%c0_15, %c0_16] : memref<16x128xf32, #tpu.memory_space<vmem>>, vector<16x128xf32>
    %23 = tpu.concatenate %22, %21 in 0 : vector<16x128xf32>, vector<8x128xf32> -> vector<24x128xf32>
    %24 = arith.truncf %23 : vector<24x128xf32> to vector<24x128xbf16>
    %c0_17 = arith.constant 0 : index
    %c0_18 = arith.constant 0 : index
    %25 = vector.load %arg10[%c0_17, %c0_18] : memref<128x512xbf16, #tpu.memory_space<vmem>>, vector<128x512xbf16>
    %cst_19 = arith.constant dense<0.000000e+00> : vector<24x512xf32>
    %26 = tpu.matmul %24, %25, %cst_19 {dimension_numbers = #tpu.dot_dimension_numbers<[1], [0], [0], [1], [0, 0, 1, 1], [], []>} : vector<24x128xbf16>, vector<128x512xbf16>, vector<24x512xf32> -> vector<24x512xf32>
    %27 = vector.extract_strided_slice %26 {offsets = [0, 0], sizes = [8, 256], strides = [1, 1]} : vector<24x512xf32> to vector<8x256xf32>
    %28 = vector.extract_strided_slice %26 {offsets = [0, 256], sizes = [8, 256], strides = [1, 1]} : vector<24x512xf32> to vector<8x256xf32>
    %29 = vector.extract_strided_slice %26 {offsets = [8, 0], sizes = [8, 256], strides = [1, 1]} : vector<24x512xf32> to vector<8x256xf32>
    %30 = vector.extract_strided_slice %26 {offsets = [8, 256], sizes = [8, 256], strides = [1, 1]} : vector<24x512xf32> to vector<8x256xf32>
    %31 = vector.extract_strided_slice %26 {offsets = [16, 0], sizes = [8, 256], strides = [1, 1]} : vector<24x512xf32> to vector<8x256xf32>
    %32 = vector.extract_strided_slice %26 {offsets = [16, 256], sizes = [8, 256], strides = [1, 1]} : vector<24x512xf32> to vector<8x256xf32>
    %33 = arith.mulf %27, %31 : vector<8x256xf32>
    %34 = arith.mulf %28, %32 : vector<8x256xf32>
    %35 = arith.subf %33, %34 : vector<8x256xf32>
    %36 = arith.mulf %27, %32 : vector<8x256xf32>
    %37 = arith.mulf %28, %31 : vector<8x256xf32>
    %38 = arith.addf %36, %37 : vector<8x256xf32>
    %39 = arith.mulf %35, %29 : vector<8x256xf32>
    %40 = arith.mulf %38, %30 : vector<8x256xf32>
    %41 = arith.subf %39, %40 : vector<8x256xf32>
    %42 = arith.mulf %35, %30 : vector<8x256xf32>
    %43 = arith.mulf %38, %29 : vector<8x256xf32>
    %44 = arith.addf %42, %43 : vector<8x256xf32>
    %45 = arith.truncf %41 : vector<8x256xf32> to vector<8x256xbf16>
    %c0_20 = arith.constant 0 : index
    %c0_21 = arith.constant 0 : index
    %46 = vector.load %arg11[%c0_20, %c0_21] : memref<256x128xbf16, #tpu.memory_space<vmem>>, vector<256x128xbf16>
    %cst_22 = arith.constant dense<0.000000e+00> : vector<8x128xf32>
    %47 = tpu.matmul %45, %46, %cst_22 {dimension_numbers = #tpu.dot_dimension_numbers<[1], [0], [0], [1], [0, 0, 1, 1], [], []>} : vector<8x256xbf16>, vector<256x128xbf16>, vector<8x128xf32> -> vector<8x128xf32>
    %48 = arith.truncf %44 : vector<8x256xf32> to vector<8x256xbf16>
    %c0_23 = arith.constant 0 : index
    %c0_24 = arith.constant 0 : index
    %49 = vector.load %arg12[%c0_23, %c0_24] : memref<256x128xbf16, #tpu.memory_space<vmem>>, vector<256x128xbf16>
    %cst_25 = arith.constant dense<0.000000e+00> : vector<8x128xf32>
    %50 = tpu.matmul %48, %49, %cst_25 {dimension_numbers = #tpu.dot_dimension_numbers<[1], [0], [0], [1], [0, 0, 1, 1], [], []>} : vector<8x256xbf16>, vector<256x128xbf16>, vector<8x128xf32> -> vector<8x128xf32>
    %51 = arith.addf %47, %50 : vector<8x128xf32>
    %c0_26 = arith.constant 0 : index
    %c0_27 = arith.constant 0 : index
    %52 = vector.load %arg3[%c0_26, %c0_27] : memref<8x16xf32, #tpu.memory_space<vmem>>, vector<8x16xf32>
    %cst_28 = arith.constant dense<0.000000e+00> : vector<8x128xf32>
    %53 = tpu.matmul %52, %0, %cst_28 {dimension_numbers = #tpu.dot_dimension_numbers<[1], [0], [0], [1], [0, 0, 1, 1], [], []>} : vector<8x16xf32>, vector<16x128xf32>, vector<8x128xf32> -> vector<8x128xf32>
    %cst_29 = arith.constant dense<0xFF800000> : vector<128xf32>
    %54 = vector.multi_reduction <maximumf>, %53, %cst_29 [0] : vector<8x128xf32> to vector<128xf32>
    %55 = vector.shape_cast %54 : vector<128xf32> to vector<1x128xf32>
    %56 = vector.broadcast %55 : vector<1x128xf32> to vector<8x128xf32>
    %57 = arith.subf %53, %56 : vector<8x128xf32>
    %58 = math.exp %57 : vector<8x128xf32>
    %c0_30 = arith.constant 0 : index
    %c0_31 = arith.constant 0 : index
    %59 = vector.load %arg5[%c0_30, %c0_31] : memref<2x8xf32, #tpu.memory_space<vmem>>, vector<2x8xf32>
    %60 = arith.mulf %51, %58 : vector<8x128xf32>
    %cst_32 = arith.constant dense<0.000000e+00> : vector<2x128xf32>
    %61 = tpu.matmul %59, %60, %cst_32 {dimension_numbers = #tpu.dot_dimension_numbers<[1], [0], [0], [1], [0, 0, 1, 1], [], []>} : vector<2x8xf32>, vector<8x128xf32>, vector<2x128xf32> -> vector<2x128xf32>
    %c0_33 = arith.constant 0 : index
    %c0_34 = arith.constant 0 : index
    %62 = vector.load %arg6[%c0_33, %c0_34] : memref<2x8xf32, #tpu.memory_space<vmem>>, vector<2x8xf32>
    %cst_35 = arith.constant dense<0.000000e+00> : vector<2x128xf32>
    %63 = tpu.matmul %62, %58, %cst_35 {dimension_numbers = #tpu.dot_dimension_numbers<[1], [0], [0], [1], [0, 0, 1, 1], [], []>} : vector<2x8xf32>, vector<8x128xf32>, vector<2x128xf32> -> vector<2x128xf32>
    %c0_36 = arith.constant 0 : index
    %c0_37 = arith.constant 0 : index
    %64 = vector.load %arg4[%c0_36, %c0_37] : memref<2x128xf32, #tpu.memory_space<vmem>>, vector<2x128xf32>
    %65 = tpu.reciprocal %63 {approx = true} : vector<2x128xf32> -> vector<2x128xf32>
    %66 = arith.mulf %61, %65 : vector<2x128xf32>
    %67 = arith.addf %64, %66 : vector<2x128xf32>
    %c0_38 = arith.constant 0 : index
    %c0_39 = arith.constant 0 : index
    %68 = vector.load %arg13[%c0_38, %c0_39] : memref<2x128xf32, #tpu.memory_space<vmem>>, vector<2x128xf32>
    tpu.vector_store %arg13[%c0_38, %c0_39], %67 {strides = array<i32>} : memref<2x128xf32, #tpu.memory_space<vmem>>, vector<2x128xf32>,
    return
  }
}

</mosaic_0001>

<bundles_post_ra>
// kernel: resonance_block_forward.1
= control target key start
LH: loop header
LB: loop body
LE: loop exit
PB: predicated region body
PF: predicated region fallthrough
CT: control target
= control target key end

     0   :  { %v1489_v3 = vmov 0.0   ;;  %vm1490_vm0 = vmmov 0   ;;  %s1834_s0 = inlined_call_operand.vmem [shape: f32[8,16], index: 0, kind: input, shape index: {}]   ;;  %s1835_s1 = inlined_call_operand.vmem [shape: f32[8,16], index: 1, kind: input, shape index: {}]   ;;  %s1836_s2 = inlined_call_operand.vmem [shape: f32[16,128], index: 2, kind: input, shape index: {}]   ;;  %s1837_s3 = inlined_call_operand.vmem [shape: f32[8,16], index: 3, kind: input, shape index: {}]   ;;  %s1838_s4 = inlined_call_operand.vmem [shape: f32[2,128], index: 4, kind: input, shape index: {}]   ;;  %s1839_s5 = inlined_call_operand.vmem [shape: f32[2,8], index: 5, kind: input, shape index: {}]   ;;  %s1840_s6 = inlined_call_operand.vmem [shape: f32[2,8], index: 6, kind: input, shape index: {}]   ;;  %s1841_s7 = inlined_call_operand.vmem [shape: f32[16,128], index: 7, kind: input, shape index: {}]   ;;  %s1842_s8 = inlined_call_operand.vmem [shape: f32[16,16], index: 8, kind: input, shape index: {}]   ;;  %s1843_s9 = inlined_call_operand.vmem [shape: f32[16,128], index: 9, kind: input, shape index: {}]   ;;  %s1844_s10 = inlined_call_operand.vmem [shape: bf16[128,512], index: 10, kind: input, shape index: {}]   ;;  %s1845_s11 = inlined_call_operand.vmem [shape: bf16[256,128], index: 11, kind: input, shape index: {}]   ;;  %s1846_s12 = inlined_call_operand.vmem [shape: bf16[256,128], index: 12, kind: input, shape index: {}]   ;;  %s1847_s13 = inlined_call_operand.hbm [shape: f32[2,128], index: 13, kind: output, shape index: {}]  }
   0x1   :  { %v61_v0 = vld [vmem:[%s1842_s8 + $0x8] sm:$0xff]  ;;  %v60_v1 = vld [vmem:[%s1842_s8] sm:$0xff]  ;;  %1333 = vmatprep.subr.mxu0 %v1489_v3  ;;  %1337 = vmatprep.mubr.msk.f32.mxu0 %vm1490_vm0, %v1489_v3 }
   0x2   :  { %v48_v2 = vld [vmem:[%s1835_s1] sm:$0xff]  ;;  %1334 = vmatpush3.msra.mxu0 %v61_v0  ;;  %1340 = vmatprep.subr.mxu1 %v1489_v3 }
   0x3   :  { %v1202_v4 = vmul.f32 -1.442695, %v48_v2  ;;  %1335 = vmatprep.subr.mxu0 %v1489_v3  ;;  %1344 = vmatprep.mubr.msk.f32.mxu1 %vm1490_vm0, %v1489_v3 }
   0x4   :  { %1336 = vmatpush3.msra.mxu0 %v60_v1 }
   0x5   :  { %1455 = vpow2.f32 %v1202_v4  ;;  %1347 = vmatprep.subr.mxu0 %v1489_v3 }
  0x12   :  { %v1456_v5 = vpop.eup %1455 }
  0x13   :  { %v52_v6 = vadd.f32 1.0, %v1456_v5 }
  0x15   :  { %1457 = vrcp.f32 %v52_v6 }
  0x22   :  { %v1458_v7 = vpop.eup %1457 }
  0x23   :  { %v55_v8 = vmul.f32 0.9702, %v1458_v7 }
  0x24   :  { %18 = vsyncpa [#allocation3], 0  ;;  %vm62_vm1 = vcmask 130048   ;;  %v213_v13 = vld [vmem:[%s1841_s7 + $0x8] sm:$0xff]  ;;  %v212_v15 = vld [vmem:[%s1841_s7] sm:$0xff]  ;;  %v1491_v37 = vmov 0  }
  0x25   :  { %v56_v9 = vadd.f32 0.02, %v55_v8  ;;  %v1589_v14 = vld [vmem:[%s1843_s9 + $0x8] sm:$0xff]  ;;  %v211_v16 = vld [vmem:[%s1834_s0] sm:$0xff]  ;;  %v1423_v60 = vld [vmem:[%s1846_s12 + $0x78] sm:$0xff]   ;;  %vm1035_vm2 = vcmask 64512  }
  0x26   :  { %1341 = vmatpush3.msra.mxu1 %v1589_v14  ;;  %v1601_v17 = vld [vmem:[%s1843_s9] sm:$0xff]  ;;  %v1378_v19 = vld [vmem:[%s1844_s10 + $0xe8] ss:$16 sps:$4 sm:$0xff]   ;;  %v1380_v20 = vld [vmem:[%s1844_s10 + $0xec] ss:$16 sps:$4 sm:$0xff]  }
  0x27   :  { %v57_v10 = vadd.f32 1e-12, %v56_v9  ;;  %1342 = vmatprep.subr.mxu1 %v1489_v3  ;;  %v1377_v18 = vld [vmem:[%s1844_s10 + $0xe4] ss:$16 sps:$4 sm:$0xff]   ;;  %v1386_v21 = vld [vmem:[%s1844_s10 + $0xcc] ss:$16 sps:$4 sm:$0xff]  }
  0x28   :  { %1343 = vmatpush3.msra.mxu1 %v1601_v17  ;;  %v1384_v22 = vld [vmem:[%s1844_s10 + $0xc8] ss:$16 sps:$4 sm:$0xff]   ;;  %v1392_v23 = vld [vmem:[%s1844_s10 + $0xac] ss:$16 sps:$4 sm:$0xff]   ;;  %v288_v35 = vld [vmem:[%s1836_s2] sm:$0xff] }
  0x29   :  { %1459 = vlog2.f32 %v57_v10  ;;  %484 = vmatprep.subr.bf16.mxu1 %v1377_v18  ;;  %v1390_v24 = vld [vmem:[%s1844_s10 + $0xa8] ss:$16 sps:$4 sm:$0xff]   ;;  %v1398_v25 = vld [vmem:[%s1844_s10 + $0x8c] ss:$16 sps:$4 sm:$0xff]   ;;  %v1375_v42 = vld [vmem:[%s1844_s10 + $0xe0] ss:$16 sps:$4 sm:$0xff]  }
  0x2a   :  { %v1396_v26 = vld [vmem:[%s1844_s10 + $0x88] ss:$16 sps:$4 sm:$0xff]   ;;  %v1404_v27 = vld [vmem:[%s1844_s10 + $0x6c] ss:$16 sps:$4 sm:$0xff]   ;;  %v1383_v43 = vld [vmem:[%s1844_s10 + $0xc4] ss:$16 sps:$4 sm:$0xff]  }
  0x2b   :  { %v1402_v28 = vld [vmem:[%s1844_s10 + $0x68] ss:$16 sps:$4 sm:$0xff]   ;;  %v1410_v29 = vld [vmem:[%s1844_s10 + $0x4c] ss:$16 sps:$4 sm:$0xff]   ;;  %v1381_v45 = vld [vmem:[%s1844_s10 + $0xc0] ss:$16 sps:$4 sm:$0xff]  }
  0x2c   :  { %v1408_v30 = vld [vmem:[%s1844_s10 + $0x48] ss:$16 sps:$4 sm:$0xff]   ;;  %v1416_v31 = vld [vmem:[%s1844_s10 + $0x2c] ss:$16 sps:$4 sm:$0xff]   ;;  %v1389_v46 = vld [vmem:[%s1844_s10 + $0xa4] ss:$16 sps:$4 sm:$0xff]  }
  0x2d   :  { %v1414_v32 = vld [vmem:[%s1844_s10 + $0x28] ss:$16 sps:$4 sm:$0xff]   ;;  %v1422_v33 = vld [vmem:[%s1844_s10 + $0xc] ss:$16 sps:$4 sm:$0xff]   ;;  %v1387_v47 = vld [vmem:[%s1844_s10 + $0xa0] ss:$16 sps:$4 sm:$0xff]  }
  0x2e   :  { %v1420_v34 = vld [vmem:[%s1844_s10 + $0x8] ss:$16 sps:$4 sm:$0xff]   ;;  %v1395_v48 = vld [vmem:[%s1844_s10 + $0x84] ss:$16 sps:$4 sm:$0xff]   ;;  %v1393_v49 = vld [vmem:[%s1844_s10 + $0x80] ss:$16 sps:$4 sm:$0xff]  }
  0x2f   :  { %v289_v36 = vld [vmem:[%s1836_s2 + $0x8] sm:$0xff]  ;;  %v1401_v50 = vld [vmem:[%s1844_s10 + $0x64] ss:$16 sps:$4 sm:$0xff]   ;;  %v1399_v51 = vld [vmem:[%s1844_s10 + $0x60] ss:$16 sps:$4 sm:$0xff]  }
  0x30   :  { %v290_v38 = vpack.c.bf16 %v289_v36, %v288_v35  ;;  %v1407_v52 = vld [vmem:[%s1844_s10 + $0x44] ss:$16 sps:$4 sm:$0xff]   ;;  %v1405_v53 = vld [vmem:[%s1844_s10 + $0x40] ss:$16 sps:$4 sm:$0xff]   ;;  %v1424_v61 = vld [vmem:[%s1845_s11 + $0x78] sm:$0xff]  }
  0x31   :  { %v1413_v54 = vld [vmem:[%s1844_s10 + $0x24] ss:$16 sps:$4 sm:$0xff]   ;;  %v1411_v55 = vld [vmem:[%s1844_s10 + $0x20] ss:$16 sps:$4 sm:$0xff]   ;;  %v1425_v62 = vld [vmem:[%s1846_s12 + $0x38] sm:$0xff]  }
  0x32   :  { %v1419_v56 = vld [vmem:[%s1844_s10 + $0x4] ss:$16 sps:$4 sm:$0xff]   ;;  %v1417_v57 = vld [vmem:[%s1844_s10] ss:$16 sps:$4 sm:$0xff]   ;;  %v1426_v63 = vld [vmem:[%s1845_s11 + $0x38] sm:$0xff]  }
  0x33   :  { %v1427_v0 = vld [vmem:[%s1846_s12 + $0x70] sm:$0xff]   ;;  %v1431_v5 = vld [vmem:[%s1846_s12 + $0x68] sm:$0xff]   ;;  %v1435_v9 = vld [vmem:[%s1846_s12 + $0x60] sm:$0xff]  }
  0x34   :  { %v1428_v1 = vld [vmem:[%s1845_s11 + $0x70] sm:$0xff]   ;;  %v1432_v6 = vld [vmem:[%s1845_s11 + $0x68] sm:$0xff]   ;;  %v1436_v10 = vld [vmem:[%s1845_s11 + $0x60] sm:$0xff]  }
  0x35   :  { %v1429_v2 = vld [vmem:[%s1846_s12 + $0x30] sm:$0xff]   ;;  %v1433_v7 = vld [vmem:[%s1846_s12 + $0x28] sm:$0xff]   ;;  %v1442_v18 = vld [vmem:[%s1845_s11 + $0x18] sm:$0xff]  }
  0x36   :  { %v1460_v11 = vpop.eup %1459  ;;  %v1430_v4 = vld [vmem:[%s1845_s11 + $0x30] sm:$0xff]   ;;  %v1434_v8 = vld [vmem:[%s1845_s11 + $0x28] sm:$0xff]  }
  0x37   :  { %v59_v12 = vmul.f32 0.6931472, %v1460_v11  ;;  %v1437_v11 = vld [vmem:[%s1846_s12 + $0x20] sm:$0xff]  }
  0x39   :  { %1338 = vmatmul.mubr.msk.f32.vlgmr.msra.gmra.mxu0 %vm62_vm1, %v59_v12  ;;  %v1438_v12 = vld [vmem:[%s1845_s11 + $0x20] sm:$0xff]  }
  0x3a   :  { %1351 = vmatprep.mubr.msk.f32.mxu0 %vm1490_vm0, %v1489_v3  ;;  %1348 = vmatpush3.msra.mxu0 %v213_v13  ;;  %v1439_v13 = vld [vmem:[%s1846_s12 + $0x58] sm:$0xff]  }
  0x3b   :  { %1349 = vmatprep.subr.mxu0 %v1489_v3 }
  0x3c   :  { %1350 = vmatpush3.msra.mxu0 %v212_v15  ;;  %v1440_v15 = vld [vmem:[%s1845_s11 + $0x58] sm:$0xff]  }
  0x3d   :  { %1352 = vmatmul.mubr.msk.f32.vlgmr.msra.gmra.mxu0 %vm62_vm1, %v211_v16  ;;  %535 = vmatprep.subr.bf16.mxu0 %v1380_v20  ;;  %v1441_v16 = vld [vmem:[%s1846_s12 + $0x18] sm:$0xff]  }
  0x3e   :  { %536 = vmatpush1.bf16.msra.mxu0 %v1378_v19  ;;  %567 = vmatprep.mubr.bf16.mxu0 %v1491_v37 }
  0x3f   :  { %537 = vmatprep.subr.bf16.mxu0 %v1386_v21 }
  0x42   :  { %538 = vmatpush1.bf16.msra.mxu0 %v1384_v22 }
  0x43   :  { %539 = vmatprep.subr.bf16.mxu0 %v1392_v23  ;;  %v1443_v23 = vld [vmem:[%s1846_s12 + $0x50] sm:$0xff]  }
  0x46   :  { %540 = vmatpush1.bf16.msra.mxu0 %v1390_v24  ;;  %v1444_v24 = vld [vmem:[%s1845_s11 + $0x50] sm:$0xff]  }
  0x47   :  { %541 = vmatprep.subr.bf16.mxu0 %v1398_v25  ;;  %v1445_v25 = vld [vmem:[%s1846_s12 + $0x10] sm:$0xff]  }
  0x4a   :  { %542 = vmatpush1.bf16.msra.mxu0 %v1396_v26  ;;  %v1446_v26 = vld [vmem:[%s1845_s11 + $0x10] sm:$0xff]  }
  0x4b   :  { %543 = vmatprep.subr.bf16.mxu0 %v1404_v27  ;;  %v1447_v27 = vld [vmem:[%s1846_s12 + $0x48] sm:$0xff]  }
  0x4e   :  { %544 = vmatpush1.bf16.msra.mxu0 %v1402_v28  ;;  %v1448_v28 = vld [vmem:[%s1845_s11 + $0x48] sm:$0xff]  }
  0x4f   :  { %545 = vmatprep.subr.bf16.mxu0 %v1410_v29  ;;  %v1449_v29 = vld [vmem:[%s1846_s12 + $0x8] sm:$0xff]  }
  0x52   :  { %546 = vmatpush1.bf16.msra.mxu0 %v1408_v30  ;;  %v1450_v30 = vld [vmem:[%s1845_s11 + $0x8] sm:$0xff]  }
  0x53   :  { %547 = vmatprep.subr.bf16.mxu0 %v1416_v31  ;;  %v1451_v31 = vld [vmem:[%s1846_s12 + $0x40] sm:$0xff]  }
  0x56   :  { %548 = vmatpush1.bf16.msra.mxu0 %v1414_v32  ;;  %v1452_v32 = vld [vmem:[%s1845_s11 + $0x40] sm:$0xff]  }
  0x57   :  { %549 = vmatprep.subr.bf16.mxu0 %v1422_v33  ;;  %v1453_v33 = vld [vmem:[%s1846_s12] sm:$0xff]  }
  0x5a   :  { %550 = vmatpush1.bf16.msra.mxu0 %v1420_v34  ;;  %v1454_v34 = vld [vmem:[%s1845_s11] sm:$0xff]  }
  0x5b   :  { %1304 = vmatprep.subr.bf16.mxu0 %v1424_v61 }
  0x5d   :  { %568 = vmatmul.mubr.bf16.vlgmr.msra.gmra.mxu0 %v290_v38 }
  0x5e   :  { %577 = vmatprep.mubr.bf16.mxu0 %v1491_v37  ;;  %1305 = vmatpush3.bf16.msra.mxu0 %v1426_v63 }
  0x5f   :  { %1306 = vmatprep.subr.bf16.mxu0 %v1428_v1 }
  0x62   :  { %1307 = vmatpush3.bf16.msra.mxu0 %v1430_v4 }
  0x63   :  { %1308 = vmatprep.subr.bf16.mxu0 %v1432_v6 }
  0x66   :  { %1309 = vmatpush3.bf16.msra.mxu0 %v1434_v8 }
  0x67   :  { %1310 = vmatprep.subr.bf16.mxu0 %v1436_v10 }
  0x6a   :  { %1311 = vmatpush3.bf16.msra.mxu0 %v1438_v12 }
  0x6b   :  { %1312 = vmatprep.subr.bf16.mxu0 %v1440_v15 }
  0x6e   :  { %1313 = vmatpush3.bf16.msra.mxu0 %v1442_v18  ;;  %v950_v18 = vld [vmem:[%s1837_s3] sm:$0xff] }
  0x6f   :  { %1314 = vmatprep.subr.bf16.mxu0 %v1444_v24 }
  0x72   :  { %1315 = vmatpush3.bf16.msra.mxu0 %v1446_v26 }
  0x73   :  { %1316 = vmatprep.subr.bf16.mxu0 %v1448_v28 }
  0x76   :  { %1317 = vmatpush3.bf16.msra.mxu0 %v1450_v30 }
  0x77   :  { %1318 = vmatprep.subr.bf16.mxu0 %v1452_v32 }
  0x7a   :  { %1319 = vmatpush3.bf16.msra.mxu0 %v1454_v34 }
  0x7b   :  { %1361 = vmatprep.subr.mxu0 %v1489_v3 }
  0xf9   :  { %v132_v39 = vpop.f32.mrf.mxu0 }
  0xfa   :  { %v136_v40 = vmul.f32 1.442695, %v132_v39 }
  0xfb   :  { %v1339_v41 = vpop.f32.mrf.mxu0 }
  0xfc   :  { %1461 = vpow2.f32 %v136_v40 }
  0xfd   :  { %v283_v58 = vpop.f32.mrf.mxu0 }
  0xff   :  { %v1353_v59 = vpop.f32.mrf.mxu0 }
 0x109   :  { %v1462_v44 = vpop.eup %1461 }
 0x10a   :  { %1345 = vmatmul.mubr.msk.f32.vlgmr.msra.gmra.mxu1 %vm62_vm1, %v1462_v44 }
 0x10b   :  { %485 = vmatpush1.bf16.msra.mxu1 %v1375_v42  ;;  %516 = vmatprep.mubr.bf16.mxu1 %v1491_v37 }
 0x10c   :  { %486 = vmatprep.subr.bf16.mxu1 %v1383_v43 }
 0x10f   :  { %487 = vmatpush1.bf16.msra.mxu1 %v1381_v45 }
 0x110   :  { %488 = vmatprep.subr.bf16.mxu1 %v1389_v46 }
 0x113   :  { %489 = vmatpush1.bf16.msra.mxu1 %v1387_v47 }
 0x114   :  { %490 = vmatprep.subr.bf16.mxu1 %v1395_v48 }
 0x117   :  { %491 = vmatpush1.bf16.msra.mxu1 %v1393_v49 }
 0x118   :  { %492 = vmatprep.subr.bf16.mxu1 %v1401_v50 }
 0x11b   :  { %493 = vmatpush1.bf16.msra.mxu1 %v1399_v51 }
 0x11c   :  { %494 = vmatprep.subr.bf16.mxu1 %v1407_v52 }
 0x11d   :  { %v569_v36 = vpop.f32.mrf.mxu0 }
 0x11f   :  { %495 = vmatpush1.bf16.msra.mxu1 %v1405_v53 }
 0x120   :  { %496 = vmatprep.subr.bf16.mxu1 %v1413_v54 }
 0x123   :  { %497 = vmatpush1.bf16.msra.mxu1 %v1411_v55 }
 0x124   :  { %498 = vmatprep.subr.bf16.mxu1 %v1419_v56 }
 0x127   :  { %499 = vmatpush1.bf16.msra.mxu1 %v1417_v57 }
 0x128   :  { %1282 = vmatprep.subr.bf16.mxu1 %v1423_v60 }
 0x12a   :  { %517 = vmatmul.mubr.bf16.vlgmr.msra.gmra.mxu1 %v290_v38  ;;  %v571_v38 = vpop.f32.mrf.mxu0 }
 0x12b   :  { %526 = vmatprep.mubr.bf16.mxu1 %v1491_v37  ;;  %1283 = vmatpush3.bf16.msra.mxu1 %v1425_v62 }
 0x12c   :  { %1284 = vmatprep.subr.bf16.mxu1 %v1427_v0  ;;  %v573_v40 = vpop.f32.mrf.mxu0 }
 0x12e   :  { %v575_v42 = vpop.f32.mrf.mxu0 }
 0x12f   :  { %1285 = vmatpush3.bf16.msra.mxu1 %v1429_v2 }
 0x130   :  { %1286 = vmatprep.subr.bf16.mxu1 %v1431_v5 }
 0x133   :  { %1287 = vmatpush3.bf16.msra.mxu1 %v1433_v7 }
 0x134   :  { %1288 = vmatprep.subr.bf16.mxu1 %v1435_v9 }
 0x137   :  { %1289 = vmatpush3.bf16.msra.mxu1 %v1437_v11 }
 0x138   :  { %1290 = vmatprep.subr.bf16.mxu1 %v1439_v13 }
 0x13b   :  { %1291 = vmatpush3.bf16.msra.mxu1 %v1441_v16 }
 0x13c   :  { %1292 = vmatprep.subr.bf16.mxu1 %v1443_v23 }
 0x13f   :  { %1293 = vmatpush3.bf16.msra.mxu1 %v1445_v25 }
 0x140   :  { %1294 = vmatprep.subr.bf16.mxu1 %v1447_v27 }
 0x143   :  { %1295 = vmatpush3.bf16.msra.mxu1 %v1449_v29 }
 0x144   :  { %1296 = vmatprep.subr.bf16.mxu1 %v1451_v31 }
 0x147   :  { %1297 = vmatpush3.bf16.msra.mxu1 %v1453_v33 }
 0x148   :  { %1354 = vmatprep.subr.mxu1 %v1489_v3 }
 0x1ca   :  { %v207_v19 = vpop.f32.mrf.mxu1 }
 0x1cb   :  { %v287_v20 = vmul.f32 %v283_v58, %v207_v19 }
 0x1cc   :  { %v1346_v21 = vpop.f32.mrf.mxu1 }
 0x1cd   :  { %v291_v22 = vpack.c.bf16 %v287_v20, %v287_v20 }
 0x1cf   :  { %527 = vmatmul.mubr.bf16.gmra.mxu1 %v291_v22  ;;  %578 = vmatmul.mubr.bf16.gmra.mxu0 %v291_v22 }
 0x1ea   :  { %v518_v35 = vpop.f32.mrf.mxu1 }
 0x1ec   :  { %v520_v37 = vpop.f32.mrf.mxu1 }
 0x1ee   :  { %v522_v39 = vpop.f32.mrf.mxu1 }
 0x1f0   :  { %v524_v41 = vpop.f32.mrf.mxu1 }
 0x28f   :  { %v528_v43 = vpop.f32.mrf.mxu1  ;;  %v579_v44 = vpop.f32.mrf.mxu0 }
 0x290   :  { %v586_v45 = vmul.f32 %v528_v43, %v518_v35  ;;  %v594_v46 = vmul.f32 %v569_v36, %v528_v43  ;;  %v588_v47 = vmul.f32 %v579_v44, %v569_v36  ;;  %v592_v48 = vmul.f32 %v579_v44, %v518_v35 }
 0x291   :  { %v530_v49 = vpop.f32.mrf.mxu1  ;;  %v581_v50 = vpop.f32.mrf.mxu0 }
 0x292   :  { %v590_v51 = vsub.f32 %v586_v45, %v588_v47  ;;  %v596_v52 = vadd.f32 %v594_v46, %v592_v48  ;;  %v587_v53 = vmul.f32 %v530_v49, %v520_v37  ;;  %v595_v54 = vmul.f32 %v571_v38, %v530_v49  ;;  %v1183_v46 = vld [vmem:[%s1838_s4] sm:$0x3] }
 0x293   :  { %v589_v55 = vmul.f32 %v581_v50, %v571_v38  ;;  %v593_v56 = vmul.f32 %v581_v50, %v520_v37  ;;  %v532_v57 = vpop.f32.mrf.mxu1  ;;  %v583_v58 = vpop.f32.mrf.mxu0  ;;  %v1109_v37 = vld [vmem:[%s1840_s6] sm:$0x3]  ;;  %s1492_s6 = smov [#allocation2]  }
 0x294   :  { %v598_v59 = vmul.f32 %v590_v51, %v522_v39  ;;  %v600_v60 = vmul.f32 %v596_v52, %v573_v40  ;;  %v604_v61 = vmul.f32 %v590_v51, %v573_v40  ;;  %v606_v62 = vmul.f32 %v596_v52, %v522_v39  ;;  %v1033_v40 = vld [vmem:[%s1839_s5] sm:$0x3]  ;;  %s1194_s2 = sshll.u32 %s1492_s6, 4  ;;  %s1195_s2 = int_to_ptr.vmem [resolvable:$true] %s1194_s2 }
 0x295   :  { %v591_v63 = vsub.f32 %v587_v53, %v589_v55  ;;  %v597_v0 = vadd.f32 %v595_v54, %v593_v56  ;;  %v533_v1 = vpop.f32.mrf.mxu1  ;;  %v584_v2 = vpop.f32.mrf.mxu0  ;;  %s1467_s5 = scalar_lea.vmem %s1195_s2, 32  ;;  %p1472_p1 = scmp.lt.s32.totalorder %s1195_s2, %s1195_s2 }
 0x296   :  { %v602_v8 = vsub.f32 %v598_v59, %v600_v60  ;;  %v608_v9 = vadd.f32 %v606_v62, %v604_v61  ;;  %p1468_p0 = scmp.ne.s32.totalorder %s1195_s2, %s1467_s5  ;;  %p1473_p2 = scmp.lt.s32.totalorder %s1467_s5, %s1467_s5 }
 0x297   :  { %v599_v4 = vmul.f32 %v591_v63, %v524_v41  ;;  %v601_v5 = vmul.f32 %v597_v0, %v575_v42  ;;  %v605_v6 = vmul.f32 %v591_v63, %v575_v42  ;;  %v607_v7 = vmul.f32 %v597_v0, %v524_v41 }
 0x298   :  { %v610_v15 = vpack.c.bf16 %v602_v8, %v602_v8  ;;  %v644_v16 = vpack.c.bf16 %v608_v9, %v608_v9  ;;  %p1474_p3 = por %p1473_p2, %p1472_p1 }
 0x299   :  { %v609_v10 = vadd.f32 %v607_v7, %v605_v6  ;;  %v603_v11 = vsub.f32 %v599_v4, %v601_v5 }
 0x29a   :  { %p1475_p4 = pnand %p1474_p3, %p1468_p0 }
 0x29b   :  { %v645_v12 = vpack.c.bf16 %v609_v10, %v609_v10  ;;  %v611_v13 = vpack.c.bf16 %v603_v11, %v603_v11 }
 0x29d   :  { %806 = vmatprep.mubr.bf16.mxu1 %v645_v12  ;;  %942 = vmatprep.mubr.bf16.mxu0 %v611_v13 }
 0x29e   :  { %807 = vmatmul.mubr.bf16.vlgmr.msra.gmra.mxu1 %v644_v16  ;;  %943 = vmatmul.mubr.bf16.vlgmr.msra.gmra.mxu0 %v610_v15 }
 0x29f   :  { %1355 = vmatpush3.msra.mxu1 %v1589_v14  ;;  %1358 = vmatprep.mubr.msk.f32.mxu1 %vm1490_vm0, %v1489_v3 }
 0x2a0   :  { %1356 = vmatprep.subr.mxu1 %v1489_v3  ;;  %1363 = vmatprep.mubr.msk.f32.mxu0 %vm1490_vm0, %v1489_v3 }
 0x2a1   :  { %1357 = vmatpush3.msra.mxu1 %v1601_v17 }
 0x2a2   :  { %1366 = vmatprep.subr.mxu1 %v1489_v3 }
 0x2a6   :  { %1359 = vmatmul.mubr.msk.f32.vlgmr.msra.gmra.mxu1 %vm62_vm1, %v950_v18 }
 0x2a7   :  { %1368 = vmatprep.mubr.msk.f32.mxu1 %vm1490_vm0, %v1489_v3 }
 0x35e   :  { %v1298_v14 = vpop.f32.mrf.mxu1  ;;  %v1320_v19 = vpop.f32.mrf.mxu0 }
 0x360   :  { %v1299_v20 = vpop.f32.mrf.mxu1  ;;  %v1321_v21 = vpop.f32.mrf.mxu0 }
 0x361   :  { %v1300_v3 = vadd.f32 %v1299_v20, %v1298_v14  ;;  %v1322_v35 = vadd.f32 %v1321_v21, %v1320_v19 }
 0x362   :  { %v1301_v22 = vpop.f32.mrf.mxu1  ;;  %v1323_v23 = vpop.f32.mrf.mxu0 }
 0x363   :  { %v945_v36 = vadd.f32 %v1322_v35, %v1300_v3 }
 0x364   :  { %v1302_v24 = vpop.f32.mrf.mxu1  ;;  %v1324_v25 = vpop.f32.mrf.mxu0 }
 0x366   :  { %v1020_v17 = vpop.f32.mrf.mxu1 }
 0x367   :  { %v1024_v26 = vrot.slane %v1020_v17, 4 }
 0x368   :  { %v1360_v27 = vpop.f32.mrf.mxu1 }
 0x369   :  { %v1025_v28 = vmax.f32 %v1020_v17, %v1024_v26 }
 0x36b   :  { %v1026_v29 = vrot.slane %v1025_v28, 2 }
 0x36d   :  { %v1027_v30 = vmax.f32 %v1025_v28, %v1026_v29 }
 0x36f   :  { %v1028_v31 = vrot.slane %v1027_v30, 1 }
 0x371   :  { %v1029_v32 = vmax.f32 %v1027_v30, %v1028_v31 }
 0x373   :  { %v1030_v33 = vsub.f32 %v1020_v17, %v1029_v32 }
 0x375   :  { %v1031_v34 = vmul.f32 1.442695, %v1030_v33 }
 0x377   :  { %1463 = vpow2.f32 %v1031_v34 }
 0x384   :  { %v1464_v38 = vpop.eup %1463 }
 0x385   :  { %1367 = vmatpush3.msra.mxu1 %v1464_v38  ;;  %v1034_v39 = vmul.f32 %v1464_v38, %v945_v36 }
 0x386   :  { %1369 = vmatmul.mubr.msk.f32.vlgmr.msra.gmra.mxu1 %vm1035_vm2, %v1109_v37 }
 0x387   :  { %1362 = vmatpush3.msra.mxu0 %v1034_v39 }
 0x388   :  { %1364 = vmatmul.mubr.msk.f32.vlgmr.msra.gmra.mxu0 %vm1035_vm2, %v1033_v40 }
 0x446   :  { %v1179_v41 = vpop.f32.mrf.mxu1 }
 0x447   :  { %1465 = vrcp.f32 %v1179_v41 }
 0x448   :  { %v1370_v42 = vpop.f32.mrf.mxu1  ;;  %v1105_v43 = vpop.f32.mrf.mxu0 }
 0x44a   :  { %v1365_v44 = vpop.f32.mrf.mxu0 }
 0x454   :  { %v1466_v45 = vpop.eup %1465 }
 0x455   :  { %v1185_v47 = vmul.f32 %v1466_v45, %v1105_v43 }
 0x457   :  { %v1186_v48 = vadd.f32 %v1185_v47, %v1183_v46 }
 0x459   :  { %1187 = vst [vmem:[#allocation2] sm:$0x3] %v1186_v48 }
 0x45a   :  { %1478 = shalt.err (!%p1475_p4)
}
 0x45b   :  { %1197 = dma.vmem_to_hbm [thread:$0]  %s1195_s2, 32, %s1847_s13, [#allocation3]  }
 0x45c   :  { %1487 = dma.done.wait [#allocation3], 32  }
 0x45d   :  { %1488 = vsyncadd [#allocation3], 4294967264 }
 0x45e   :  { %1201 = vsyncpa [#allocation3], 1 }

</bundles_post_ra>
